<compile_context>
chip_gen: v7x
topology: tpu7x:2x2x1
jax: 0.10.0
libtpu: 0.0.40
codegen_flags: <defaults>
</compile_context>

<pallas_src>
import jax
import jax.numpy as jnp
from jax.experimental import pallas as pl
from jax.experimental.pallas import tpu as pltpu


def _round_up(x: int, m: int) -> int:
    return (x + m - 1) // m * m


def _gather_kernel(ids_ref, table_ref, out_ref, sems):
    # ids_ref:   (n_pad,) int32 in SMEM  — scalar-prefetched token ids
    # table_ref: (V, F_pad) in HBM       — raw ref, rows DMA'd on demand
    # out_ref:   (TM, F_pad) VMEM        — gathered embedding tile
    # sems:      (TM,) DMA semaphores    — one per in-flight row copy
    tm = out_ref.shape[0]
    base = pl.program_id(0) * tm

    # Issue all row DMAs for this tile (overlapped in the DMA engine) ...
    @pl.loop(0, tm)
    def _start(t):
        tok = ids_ref[base + t]
        pltpu.make_async_copy(
            table_ref.at[pl.ds(tok, 1), :],
            out_ref.at[pl.ds(t, 1), :],
            sems.at[t],
        ).start()

    # ... then drain them. (Src index is irrelevant for the wait; only the
    # copied shape and semaphore must match.)
    @pl.loop(0, tm)
    def _wait(t):
        pltpu.make_async_copy(
            table_ref.at[pl.ds(0, 1), :],
            out_ref.at[pl.ds(t, 1), :],
            sems.at[t],
        ).wait()


def word_embedding(x, table, *, tile_tokens=128):
    """Embedding lookup: out[b, s, :] = table[x[b, s], :].

    x:     integer indices of shape (B, S)
    table: embedding table of shape (V, F)
    returns: (B, S, F) with table's dtype
    """
    b, s = x.shape
    v, f = table.shape
    n = b * s

    # Lane-dense feature dim (no-op when F is already a multiple of 128).
    f_pad = _round_up(f, 128)
    if f_pad != f:
        table = jnp.pad(table, ((0, 0), (0, f_pad - f)))

    # Token tile: big enough to amortize per-grid-step overhead, but no larger
    # than the (8-aligned) token count so tiny inputs don't over-pad.
    tm = min(tile_tokens, _round_up(n, 8))
    n_pad = _round_up(n, tm)

    # Clamp ids so an invalid index can never become an unchecked HBM read
    # (PyTorch nn.Embedding raises for OOB ids; here they read a valid row).
    idx = jnp.clip(x.reshape(-1).astype(jnp.int32), 0, v - 1)
    if n_pad != n:
        idx = jnp.pad(idx, (0, n_pad - n))  # padded tokens gather row 0, trimmed below

    out = pl.pallas_call(
        _gather_kernel,
        out_shape=jax.ShapeDtypeStruct((n_pad, f_pad), table.dtype),
        grid_spec=pltpu.PrefetchScalarGridSpec(
            num_scalar_prefetch=1,                      # idx -> SMEM
            grid=(n_pad // tm,),
            in_specs=[
                pl.BlockSpec(memory_space=pl.ANY),      # table stays in HBM
            ],
            out_specs=pl.BlockSpec((tm, f_pad), lambda i, ids: (i, 0)),
            scratch_shapes=[pltpu.SemaphoreType.DMA((tm,))],
        ),
        compiler_params=pltpu.CompilerParams(
            dimension_semantics=("parallel",),          # megacore-shardable token axis
        ),
    )(idx, table)

    return out[:n, :f].reshape(b, s, f)


if __name__ == "__main__":
    # Small, PyTorch-consistent shapes: batch=2, seq=8, vocab=64, features=32.
    B, S, V, F = 2, 8, 64, 32

    key = jax.random.PRNGKey(0)
    k_table, k_idx = jax.random.split(key)

    # nn.Embedding default init: weights ~ N(0, 1)
    table = jax.random.normal(k_table, (V, F), dtype=jnp.float32)
    x = jax.random.randint(k_idx, (B, S), 0, V, dtype=jnp.int32)

    out = word_embedding(x, table)
    out = jax.block_until_ready(out)

    # Reference check (plain JAX gather == nn.Embedding forward).
    ref = jnp.take(table, x.reshape(-1), axis=0).reshape(B, S, F)
    assert out.shape == (B, S, F)
    assert jnp.allclose(out, ref, atol=1e-6, rtol=1e-6)

    print("KERNEL_OK")
</pallas_src>

<mosaic_0001>
module attributes {stable_mosaic.version = 11 : i64} {
  func.func @_gather_kernel(%arg0: i32, %arg1: memref<16xi32, #tpu.memory_space<smem>>, %arg2: memref<64x128xf32, #tpu.memory_space<any>>, %arg3: memref<16x128xf32, #tpu.memory_space<vmem>>, %arg4: memref<16x!tpu.dma_semaphore, #tpu.memory_space<semaphore_mem>>) attributes {dimension_semantics = [#tpu.dimension_semantics<parallel>], iteration_bounds = array<i64: 1>, scalar_prefetch = 1 : i64, scratch_operands = 1 : i64, tpu.core_type = #tpu.core_type<tc>, window_params = [{}, {transform_indices = @transform_1, window_bounds = array<i64: 16, 128>}]} {
    %c16_i32 = arith.constant 16 : i32
    %0 = arith.muli %arg0, %c16_i32 : i32
    %c0_i32 = arith.constant 0 : i32
    %c16_i32_0 = arith.constant 16 : i32
    %1 = arith.addi %c0_i32, %c16_i32_0 : i32
    %c1_i32 = arith.constant 1 : i32
    scf.for %arg5 = %c0_i32 to %1 step %c1_i32  : i32 {
      %c1_i32_6 = arith.constant 1 : i32
      %3 = arith.muli %arg5, %c1_i32_6 : i32
      %c0_i32_7 = arith.constant 0 : i32
      %4 = arith.addi %c0_i32_7, %3 : i32
      %5 = arith.addi %0, %4 : i32
      %6 = arith.index_cast %5 : i32 to index
      %7 = memref.load %arg1[%6] : memref<16xi32, #tpu.memory_space<smem>>
      %c0_i32_8 = arith.constant 0 : i32
      %8 = tpu.memref_slice %arg2[%7, %c0_i32_8] : memref<64x128xf32, #tpu.memory_space<any>> -> memref<1x128xf32, #tpu.memory_space<any>>
      %c0_i32_9 = arith.constant 0 : i32
      %9 = tpu.memref_slice %arg3[%4, %c0_i32_9] : memref<16x128xf32, #tpu.memory_space<vmem>> -> memref<1x128xf32, #tpu.memory_space<vmem>>
      %10 = tpu.memref_slice %arg4[%4] : memref<16x!tpu.dma_semaphore, #tpu.memory_space<semaphore_mem>> -> memref<1x!tpu.dma_semaphore, #tpu.memory_space<semaphore_mem>>
      %11 = tpu.memref_squeeze %10 : memref<1x!tpu.dma_semaphore, #tpu.memory_space<semaphore_mem>> -> memref<!tpu.dma_semaphore, #tpu.memory_space<semaphore_mem>>
      tpu.enqueue_dma source(%8 : memref<1x128xf32, #tpu.memory_space<any>>) target(%9 : memref<1x128xf32, #tpu.memory_space<vmem>>) target_semaphore(%11 : memref<!tpu.dma_semaphore, #tpu.memory_space<semaphore_mem>>)
    }
    %c16_i32_1 = arith.constant 16 : i32
    %c0_i32_2 = arith.constant 0 : i32
    %c16_i32_3 = arith.constant 16 : i32
    %2 = arith.addi %c0_i32_2, %c16_i32_3 : i32
    %c1_i32_4 = arith.constant 1 : i32
    scf.for %arg5 = %c0_i32_2 to %2 step %c1_i32_4  : i32 {
      %c1_i32_6 = arith.constant 1 : i32
      %3 = arith.muli %arg5, %c1_i32_6 : i32
      %c0_i32_7 = arith.constant 0 : i32
      %4 = arith.addi %c0_i32_7, %3 : i32
      %c0_i32_8 = arith.constant 0 : i32
      %c0_i32_9 = arith.constant 0 : i32
      %5 = tpu.memref_slice %arg2[%c0_i32_8, %c0_i32_9] : memref<64x128xf32, #tpu.memory_space<any>> -> memref<1x128xf32, #tpu.memory_space<any>>
      %c0_i32_10 = arith.constant 0 : i32
      %6 = tpu.memref_slice %arg3[%4, %c0_i32_10] : memref<16x128xf32, #tpu.memory_space<vmem>> -> memref<1x128xf32, #tpu.memory_space<vmem>>
      %7 = tpu.memref_slice %arg4[%4] : memref<16x!tpu.dma_semaphore, #tpu.memory_space<semaphore_mem>> -> memref<1x!tpu.dma_semaphore, #tpu.memory_space<semaphore_mem>>
      %8 = tpu.memref_squeeze %7 : memref<1x!tpu.dma_semaphore, #tpu.memory_space<semaphore_mem>> -> memref<!tpu.dma_semaphore, #tpu.memory_space<semaphore_mem>>
      tpu.wait_dma2 semaphore(%8 : memref<!tpu.dma_semaphore, #tpu.memory_space<semaphore_mem>>) src(%5 : memref<1x128xf32, #tpu.memory_space<any>>) dst(%6 : memref<1x128xf32, #tpu.memory_space<vmem>>)
    }
    %c16_i32_5 = arith.constant 16 : i32
    return
  }
  func.func @transform_1(%arg0: i32, %arg1: memref<16xi32, #tpu.memory_space<smem>>) -> (i32, i32) {
    %c0_i32 = arith.constant 0 : i32
    %c0_i32_0 = arith.constant 0 : i32
    return %arg0, %c0_i32 : i32, i32
  }
}

</mosaic_0001>

<bundles_post_ra>
// kernel: tpu_custom_call.1
= control target key start
LH: loop header
LB: loop body
LE: loop exit
PB: predicated region body
PF: predicated region fallthrough
CT: control target
= control target key end

     0   :  { %s374_s0 = inlined_call_operand.hbm [shape: s32[16], index: 0, kind: input, shape index: {}]   ;;  %s375_s1 = inlined_call_operand.hbm [shape: f32[64,128], index: 1, kind: input, shape index: {}]   ;;  %s376_s2 = inlined_call_operand.hbm [shape: f32[16,128], index: 2, kind: output, shape index: {}]  }
   0x1   :  { %s225_s11 = scalar_lea.hbm %s374_s0, 16 }
   0x2   :  { %p226_p0 = scmp.ne.s32.totalorder %s374_s0, %s225_s11  ;;  %p229_p1 = scmp.lt.u32.totalorder %s225_s11, %s374_s0 }
   0x4   :  { %p231_p2 = pnand %p229_p1, %p226_p0 }
   0x6   :  { %234 = shalt.err (!%p231_p2)  }
   0x7   :  { %s303_s16 = smov [#allocation4]  }
   0x8   :  { %8 = dma.hbm_to_smem %s374_s0, 16, %s303_s16, [#allocation3] }
   0x9   :  { %289 = dma.done.wait [#allocation3], 16 }
   0xa   :  { %290 = vsyncadd [#allocation3], 4294967280 }
   0xb   :  { %10 = sfence }
   0xc   :  { %11 = vsyncpa [#allocation6], 0  ;;  %s334_s19 = smov 0  }
   0xd LB: > { %s20_s20 = sld [smem:[#allocation4 + %s297_s19]]  ;;  %s23_s21 = scalar_lea.vmem [#allocation5], %s297_s19  ;;  %s297_s19 = sphi %s334_s19, %s18_s19  }
   0xe   : > { %s32_s22 = sshll.u32 %s23_s21, 4  ;;  %s24_s26 = scalar_lea.sflag [#allocation2], %s297_s19  ;;  %s33_s22 = int_to_ptr.vmem [resolvable:$true] %s32_s22 }
   0xf   : > { %s237_s30 = scalar_lea.hbm %s375_s1, 1024 }
  0x13   : > { %s188_s23 = sshll.u32 %s20_s20, 4 }
  0x14   : > { %s22_s25 = scalar_lea.hbm %s375_s1, %s188_s23 }
  0x15   : > { %s235_s27 = scalar_lea.hbm %s22_s25, 16  ;;  %p238_p4 = scmp.lt.u32.totalorder %s22_s25, %s375_s1 }
  0x16   : > { %p236_p3 = scmp.ne.s32.totalorder %s22_s25, %s235_s27  ;;  %p239_p5 = scmp.lt.u32.totalorder %s237_s30, %s235_s27 }
  0x17   : > { %p241_p7 = scmp.lt.u32.totalorder %s235_s27, %s22_s25 }
  0x18   : > { %p240_p6 = por %p239_p5, %p238_p4 }
  0x1a   : > { %p242_p8 = por %p241_p7, %p240_p6 }
  0x1c   : > { %p243_p9 = pnand %p242_p8, %p236_p3 }
  0x1e   : > { %246 = shalt.err (!%p243_p9)  }
  0x1f   : > { %s247_s5 = scalar_lea.vmem %s33_s22, 16  ;;  %s304_s6 = smov [#allocation5]  }
  0x20   : > { %p248_p10 = scmp.ne.s32.totalorder %s33_s22, %s247_s5  ;;  %s249_s7 = sshll.u32 %s304_s6, 4  ;;  %s351_s7 = int_to_ptr.vmem [resolvable:$false] %s249_s7 }
  0x21   : > { %s251_s8 = scalar_lea.vmem %s351_s7, 256  ;;  %p252_p11 = scmp.lt.s32.totalorder %s33_s22, %s351_s7 }
  0x22   : > { %p253_p12 = scmp.lt.s32.totalorder %s251_s8, %s247_s5 }
  0x24   : > { %p254_p13 = por %p253_p12, %p252_p11 }
  0x26   : > { %p255_p0 = pnand %p254_p13, %p248_p10 }
  0x28   : > { %258 = shalt.err (!%p255_p0)  }
  0x29   : > { %35 = dma.hbm_to_vmem [thread:$0]  %s22_s25, 16, %s33_s22, %s24_s26 }
  0x2a   : > { %s18_s19 = sadd.s32 1, %s297_s19  }
  0x2b   : > { %p15_p1 = scmp.ge.s32.totalorder %s18_s19, 16  }
  0x2c   :  { %s299_s9 = smov (%p15_p1), 0  }
  0x2d   :  { %17 = sbr.rel (!%p15_p1) target bundleno = 13 (0xd), region = 57 }
  0x34 LB: > { %s42_s10 = scalar_lea.sflag [#allocation2], %s301_s9  ;;  %s301_s9 = sphi %s299_s9, %s41_s9  }
  0x35   : > { %291 = dma.done.wait %s42_s10, 16 }
  0x36   : > { %292 = vsyncadd %s42_s10, 4294967280  ;;  %s41_s9 = sadd.s32 1, %s301_s9  }
  0x37   : > { %p38_p2 = scmp.ge.s32.totalorder %s41_s9, 16  }
  0x38   :  { %p260_p3 = scmp.ne.s32.totalorder (%p38_p2), %s351_s7, %s251_s8  ;;  %p264_p4 = scmp.lt.s32.totalorder (%p38_p2), %s351_s7, %s351_s7 }
  0x39   :  { %40 = sbr.rel (!%p38_p2) target bundleno = 52 (0x34), region = 68  ;;  %p265_p5 = scmp.lt.s32.totalorder (%p38_p2), %s251_s8, %s251_s8 }
  0x3b   :  { %p266_p6 = por (%p38_p2), %p265_p5, %p264_p4 }
  0x3d   :  { %p267_p7 = pnand (%p38_p2), %p266_p6, %p260_p3 }
  0x40   :  { %270 = shalt.err (!%p267_p7)
}
  0x41   :  { %s271_s12 = scalar_lea.hbm %s376_s2, 256 }
  0x42   :  { %p272_p8 = scmp.ne.s32.totalorder %s376_s2, %s271_s12  ;;  %p275_p9 = scmp.lt.u32.totalorder %s271_s12, %s376_s2 }
  0x44   :  { %p277_p10 = pnand %p275_p9, %p272_p8 }
  0x46   :  { %280 = shalt.err (!%p277_p10)
}
  0x47   :  { %s305_s17 = smov 128   ;;  %s306_s18 = smov 8  }
  0x48   :  { %57 = dma.vmem_to_hbm [thread:$0]  %s351_s7, 256, %s376_s2, [#allocation6], %s305_s17, %s305_s17, %s306_s18  }
  0x49   :  { %293 = dma.done.wait [#allocation6], 256  }
  0x4a   :  { %294 = vsyncadd [#allocation6], 4294967040 }
  0x4b   :  { %61 = vsyncpa [#allocation6], 1 }
  0x4c   :  { %62 = vsyncmov [#allocation2] }
  0x4f   :  { %s63_s21 = vpop.sfrf %62 }
  0x50   :  { %p189_p11 = scmp.ne.s32.totalorder %s63_s21, 0 }
  0x52   :  { %67 = shalt.err (%p189_p11)  }
  0x53   :  { %69 = vsyncmov [#allocation2 + $0x1] }
  0x56   :  { %s70_s22 = vpop.sfrf %69 }
  0x57   :  { %p190_p12 = scmp.ne.s32.totalorder %s70_s22, 0 }
  0x59   :  { %74 = shalt.err (%p190_p12)  }
  0x5a   :  { %76 = vsyncmov [#allocation2 + $0x2] }
  0x5d   :  { %s77_s23 = vpop.sfrf %76 }
  0x5e   :  { %p191_p13 = scmp.ne.s32.totalorder %s77_s23, 0 }
  0x60   :  { %81 = shalt.err (%p191_p13)  }
  0x61   :  { %83 = vsyncmov [#allocation2 + $0x3] }
  0x64   :  { %s84_s0 = vpop.sfrf %83 }
  0x65   :  { %p192_p0 = scmp.ne.s32.totalorder %s84_s0, 0 }
  0x67   :  { %88 = shalt.err (%p192_p0)  }
  0x68   :  { %90 = vsyncmov [#allocation2 + $0x4] }
  0x6b   :  { %s91_s2 = vpop.sfrf %90 }
  0x6c   :  { %p193_p1 = scmp.ne.s32.totalorder %s91_s2, 0 }
  0x6e   :  { %95 = shalt.err (%p193_p1)  }
  0x6f   :  { %97 = vsyncmov [#allocation2 + $0x5] }
  0x72   :  { %s98_s24 = vpop.sfrf %97 }
  0x73   :  { %p194_p2 = scmp.ne.s32.totalorder %s98_s24, 0 }
  0x75   :  { %102 = shalt.err (%p194_p2)  }
  0x76   :  { %104 = vsyncmov [#allocation2 + $0x6] }
  0x79   :  { %s105_s25 = vpop.sfrf %104 }
  0x7a   :  { %p195_p3 = scmp.ne.s32.totalorder %s105_s25, 0 }
  0x7c   :  { %109 = shalt.err (%p195_p3)  }
  0x7d   :  { %111 = vsyncmov [#allocation2 + $0x7] }
  0x80   :  { %s112_s26 = vpop.sfrf %111 }
  0x81   :  { %p196_p4 = scmp.ne.s32.totalorder %s112_s26, 0 }
  0x83   :  { %116 = shalt.err (%p196_p4)  }
  0x84   :  { %118 = vsyncmov [#allocation2 + $0x8] }
  0x87   :  { %s119_s27 = vpop.sfrf %118 }
  0x88   :  { %p197_p5 = scmp.ne.s32.totalorder %s119_s27, 0 }
  0x8a   :  { %123 = shalt.err (%p197_p5)  }
  0x8b   :  { %125 = vsyncmov [#allocation2 + $0x9] }
  0x8e   :  { %s126_s28 = vpop.sfrf %125 }
  0x8f   :  { %p198_p6 = scmp.ne.s32.totalorder %s126_s28, 0 }
  0x91   :  { %130 = shalt.err (%p198_p6)  }
  0x92   :  { %132 = vsyncmov [#allocation2 + $0xa] }
  0x95   :  { %s133_s29 = vpop.sfrf %132 }
  0x96   :  { %p199_p7 = scmp.ne.s32.totalorder %s133_s29, 0 }
  0x98   :  { %137 = shalt.err (%p199_p7)  }
  0x99   :  { %139 = vsyncmov [#allocation2 + $0xb] }
  0x9c   :  { %s140_s30 = vpop.sfrf %139 }
  0x9d   :  { %p200_p8 = scmp.ne.s32.totalorder %s140_s30, 0 }
  0x9f   :  { %144 = shalt.err (%p200_p8)  }
  0xa0   :  { %146 = vsyncmov [#allocation2 + $0xc] }
  0xa3   :  { %s147_s3 = vpop.sfrf %146 }
  0xa4   :  { %p201_p9 = scmp.ne.s32.totalorder %s147_s3, 0 }
  0xa6   :  { %151 = shalt.err (%p201_p9)  }
  0xa7   :  { %153 = vsyncmov [#allocation2 + $0xd] }
  0xaa   :  { %s154_s4 = vpop.sfrf %153 }
  0xab   :  { %p202_p10 = scmp.ne.s32.totalorder %s154_s4, 0 }
  0xad   :  { %158 = shalt.err (%p202_p10)  }
  0xae   :  { %160 = vsyncmov [#allocation2 + $0xe] }
  0xb1   :  { %s161_s5 = vpop.sfrf %160 }
  0xb2   :  { %p203_p11 = scmp.ne.s32.totalorder %s161_s5, 0 }
  0xb4   :  { %165 = shalt.err (%p203_p11)  }
  0xb5   :  { %167 = vsyncmov [#allocation2 + $0xf] }
  0xb8   :  { %s168_s6 = vpop.sfrf %167 }
  0xb9   :  { %p204_p12 = scmp.ne.s32.totalorder %s168_s6, 0 }
  0xbb   :  { %172 = shalt.err (%p204_p12)  }

</bundles_post_ra>
